<compile_context>
chip_gen: v7x
topology: tpu7x:2x2x1
jax: 0.10.0
libtpu: 0.0.40
codegen_flags: <defaults>
</compile_context>

<pallas_src>
import math
import functools

import jax
import jax.numpy as jnp
from jax import lax
from jax.experimental import pallas as pl
from jax.experimental.pallas import tpu as pltpu


_INV_SQRT2 = 1.0 / math.sqrt(2.0)


def _erf_poly(x):
    """erf via Abramowitz & Stegun 7.1.26 (|abs err| <= 1.5e-7).
    Uses only exp / mul / add / div / where so it always lowers in Mosaic."""
    a1 = 0.254829592
    a2 = -0.284496736
    a3 = 1.421413741
    a4 = -1.453152027
    a5 = 1.061405429
    p = 0.3275911
    ax = jnp.abs(x)
    t = 1.0 / (1.0 + p * ax)
    poly = ((((a5 * t + a4) * t + a3) * t + a2) * t + a1) * t
    y = 1.0 - poly * jnp.exp(-ax * ax)
    return jnp.where(x >= 0, y, -y)


def _gelu_exact_kernel(x):
    # Matches torch.nn.GELU() default (erf-based, not tanh approximation)
    # to float32 precision.
    return 0.5 * x * (1.0 + _erf_poly(x * _INV_SQRT2))


def _gelu_exact_ref(x):
    # True erf, used only in the pure-JAX reference (outside the kernel).
    return 0.5 * x * (1.0 + lax.erf(x * _INV_SQRT2))


def _round_up(x, m):
    return ((x + m - 1) // m) * m


def _gmm_packed_kernel(x_ref, w1_ref, b1_ref, w2_ref, b2_ref, out_ref):
    """Single invocation, all k heads fused:
         h = GELU(x @ W1_packed + b1_packed)        (N_pad, KF_pad)
         y = h @ W2_blockdiag + b2_packed           (N_pad, KF_pad)
    Padded lanes/rows carry zeros and are stripped in the wrapper."""
    x = x_ref[...]
    h = jnp.dot(x, w1_ref[...], preferred_element_type=jnp.float32) + b1_ref[...]
    h = _gelu_exact_kernel(h)
    out_ref[...] = (
        jnp.dot(h, w2_ref[...], preferred_element_type=jnp.float32) + b2_ref[...]
    )


def gmm_distribution_forward(x, w1, b1, w2, b2, *, k):
    """x: (N, F). Per-head weights stacked as w1/w2: (k, F, F), b1/b2: (k, 1, F).
    Returns (mean (k, N, F), var (k, 25, F), muk scalar)."""
    N, F = x.shape
    KF = k * F
    n_pad = _round_up(N, 8)       # sublane multiple
    kf_pad = _round_up(KF, 128)   # lane multiple -> unmasked full-width stores

    # ---- wrapper-side repacking (layout plumbing; in a real model prepack once) ----
    x_p = jnp.zeros((n_pad, F), jnp.float32).at[:N].set(x.astype(jnp.float32))
    # W1 heads concatenated along the output (lane) axis: W1_packed[f, i*F+g] = w1[i, f, g]
    w1_p = jnp.zeros((F, kf_pad), jnp.float32).at[:, :KF].set(
        jnp.transpose(w1, (1, 0, 2)).reshape(F, KF))
    b1_p = jnp.zeros((1, kf_pad), jnp.float32).at[:, :KF].set(b1.reshape(1, KF))
    # W2 block-diagonal: W2_bd[i*F+a, j*F+b] = delta_ij * w2[i, a, b]
    w2_bd = jnp.einsum('ij,iab->iajb', jnp.eye(k, dtype=jnp.float32), w2).reshape(KF, KF)
    w2_p = jnp.zeros((kf_pad, kf_pad), jnp.float32).at[:KF, :KF].set(w2_bd)
    b2_p = jnp.zeros((1, kf_pad), jnp.float32).at[:, :KF].set(b2.reshape(1, KF))

    # ---- single-step Pallas call: whole problem resident in VMEM ----
    vmem = lambda: pl.BlockSpec(memory_space=pltpu.MemorySpace.VMEM)
    y = pl.pallas_call(
        _gmm_packed_kernel,
        out_shape=jax.ShapeDtypeStruct((n_pad, kf_pad), jnp.float32),
        in_specs=[vmem() for _ in range(5)],
        out_specs=vmem(),
    )(x_p, w1_p, b1_p, w2_p, b2_p)

    # Unpack (n_pad, kf_pad) -> (k, N, F)
    mean = jnp.transpose(y[:N, :KF].reshape(N, k, F), (1, 0, 2))

    # multi_var=False branch: constant ones((k, 25, F)) exactly as the module does.
    var = jnp.ones((k, 25, F), jnp.float32)
    # differ_muk=False branch.
    muk = jnp.float32(1.0 / k)
    return mean, var, muk


def init_params(key, k, frame_size):
    """Deterministic init mimicking torch.nn.Linear defaults
    (uniform in +/- 1/sqrt(fan_in)); synthetic weights, no checkpoint."""
    bound = 1.0 / math.sqrt(frame_size)
    ks = jax.random.split(key, 4)
    w1 = jax.random.uniform(ks[0], (k, frame_size, frame_size),
                            jnp.float32, -bound, bound)
    b1 = jax.random.uniform(ks[1], (k, 1, frame_size),
                            jnp.float32, -bound, bound)
    w2 = jax.random.uniform(ks[2], (k, frame_size, frame_size),
                            jnp.float32, -bound, bound)
    b2 = jax.random.uniform(ks[3], (k, 1, frame_size),
                            jnp.float32, -bound, bound)
    return w1, b1, w2, b2


def _reference(x, w1, b1, w2, b2):
    h = _gelu_exact_ref(jnp.einsum('nf,kfg->kng', x, w1) + b1)
    return jnp.einsum('knf,kfg->kng', h, w2) + b2


if __name__ == "__main__":
    K = 6
    FRAME_SIZE = 32
    N = 25  # matches the hard-coded 25 in the module's default `var`

    key = jax.random.PRNGKey(0)
    k_x, k_p = jax.random.split(key)
    x = jax.random.normal(k_x, (N, FRAME_SIZE), jnp.float32)
    w1, b1, w2, b2 = init_params(k_p, K, FRAME_SIZE)

    fwd = jax.jit(functools.partial(gmm_distribution_forward, k=K))
    mean, var, muk = fwd(x, w1, b1, w2, b2)
    jax.block_until_ready((mean, var, muk))

    # Lightweight correctness check against a pure-JAX reference (true lax.erf).
    ref = _reference(x, w1, b1, w2, b2)
    assert mean.shape == (K, N, FRAME_SIZE)
    assert var.shape == (K, 25, FRAME_SIZE)
    assert jnp.allclose(mean, ref, atol=1e-4, rtol=1e-4)
    assert jnp.allclose(var, 1.0)
    assert abs(float(muk) - 1.0 / K) < 1e-7

    print("KERNEL_OK")
</pallas_src>

<mosaic_0001>
module attributes {stable_mosaic.version = 11 : i64} {
  func.func @_gmm_packed_kernel(%arg0: memref<32x32xf32, #tpu.memory_space<vmem>>, %arg1: memref<32x256xf32, #tpu.memory_space<vmem>>, %arg2: memref<1x256xf32, #tpu.memory_space<vmem>>, %arg3: memref<256x256xf32, #tpu.memory_space<vmem>>, %arg4: memref<1x256xf32, #tpu.memory_space<vmem>>, %arg5: memref<32x256xf32, #tpu.memory_space<vmem>>) attributes {dimension_semantics = [], scalar_prefetch = 0 : i64, scratch_operands = 0 : i64, tpu.core_type = #tpu.core_type<tc>} {
    %c0 = arith.constant 0 : index
    %c0_0 = arith.constant 0 : index
    %0 = vector.load %arg0[%c0, %c0_0] : memref<32x32xf32, #tpu.memory_space<vmem>>, vector<32x32xf32>
    %c0_1 = arith.constant 0 : index
    %c0_2 = arith.constant 0 : index
    %1 = vector.load %arg1[%c0_1, %c0_2] : memref<32x256xf32, #tpu.memory_space<vmem>>, vector<32x256xf32>
    %cst = arith.constant dense<0.000000e+00> : vector<32x256xf32>
    %2 = tpu.matmul %0, %1, %cst {dimension_numbers = #tpu.dot_dimension_numbers<[1], [0], [0], [1], [0, 0, 1, 1], [], []>} : vector<32x32xf32>, vector<32x256xf32>, vector<32x256xf32> -> vector<32x256xf32>
    %c0_3 = arith.constant 0 : index
    %c0_4 = arith.constant 0 : index
    %3 = vector.load %arg2[%c0_3, %c0_4] : memref<1x256xf32, #tpu.memory_space<vmem>>, vector<1x256xf32>
    %4 = vector.broadcast %3 : vector<1x256xf32> to vector<32x256xf32>
    %5 = arith.addf %2, %4 : vector<32x256xf32>
    %cst_5 = arith.constant 5.000000e-01 : f32
    %6 = vector.broadcast %cst_5 : f32 to vector<32x256xf32>
    %7 = arith.mulf %6, %5 : vector<32x256xf32>
    %cst_6 = arith.constant 0.707106769 : f32
    %8 = vector.broadcast %cst_6 : f32 to vector<32x256xf32>
    %9 = arith.mulf %5, %8 : vector<32x256xf32>
    %10 = math.absf %9 : vector<32x256xf32>
    %cst_7 = arith.constant 0.327591091 : f32
    %11 = vector.broadcast %cst_7 : f32 to vector<32x256xf32>
    %12 = arith.mulf %11, %10 : vector<32x256xf32>
    %cst_8 = arith.constant 1.000000e+00 : f32
    %13 = vector.broadcast %cst_8 : f32 to vector<32x256xf32>
    %14 = arith.addf %13, %12 : vector<32x256xf32>
    %cst_9 = arith.constant 1.000000e+00 : f32
    %15 = vector.broadcast %cst_9 : f32 to vector<32x256xf32>
    %16 = arith.divf %15, %14 : vector<32x256xf32>
    %cst_10 = arith.constant 1.06140542 : f32
    %17 = vector.broadcast %cst_10 : f32 to vector<32x256xf32>
    %18 = arith.mulf %17, %16 : vector<32x256xf32>
    %cst_11 = arith.constant -1.45315206 : f32
    %19 = vector.broadcast %cst_11 : f32 to vector<32x256xf32>
    %20 = arith.addf %18, %19 : vector<32x256xf32>
    %21 = arith.mulf %20, %16 : vector<32x256xf32>
    %cst_12 = arith.constant 1.42141378 : f32
    %22 = vector.broadcast %cst_12 : f32 to vector<32x256xf32>
    %23 = arith.addf %21, %22 : vector<32x256xf32>
    %24 = arith.mulf %23, %16 : vector<32x256xf32>
    %cst_13 = arith.constant -0.284496725 : f32
    %25 = vector.broadcast %cst_13 : f32 to vector<32x256xf32>
    %26 = arith.addf %24, %25 : vector<32x256xf32>
    %27 = arith.mulf %26, %16 : vector<32x256xf32>
    %cst_14 = arith.constant 0.254829586 : f32
    %28 = vector.broadcast %cst_14 : f32 to vector<32x256xf32>
    %29 = arith.addf %27, %28 : vector<32x256xf32>
    %30 = arith.mulf %29, %16 : vector<32x256xf32>
    %cst_15 = arith.constant 0.000000e+00 : f32
    %31 = vector.broadcast %cst_15 : f32 to vector<32x256xf32>
    %32 = arith.subf %31, %10 : vector<32x256xf32>
    %33 = arith.mulf %32, %10 : vector<32x256xf32>
    %34 = math.exp %33 : vector<32x256xf32>
    %35 = arith.mulf %30, %34 : vector<32x256xf32>
    %cst_16 = arith.constant 1.000000e+00 : f32
    %36 = vector.broadcast %cst_16 : f32 to vector<32x256xf32>
    %37 = arith.subf %36, %35 : vector<32x256xf32>
    %cst_17 = arith.constant 0.000000e+00 : f32
    %38 = vector.broadcast %cst_17 : f32 to vector<32x256xf32>
    %39 = arith.cmpf oge, %9, %38 : vector<32x256xf32>
    %cst_18 = arith.constant 0.000000e+00 : f32
    %40 = vector.broadcast %cst_18 : f32 to vector<32x256xf32>
    %41 = arith.subf %40, %37 : vector<32x256xf32>
    %42 = arith.select %39, %37, %41 : vector<32x256xi1>, vector<32x256xf32>
    %cst_19 = arith.constant 1.000000e+00 : f32
    %43 = vector.broadcast %cst_19 : f32 to vector<32x256xf32>
    %44 = arith.addf %43, %42 : vector<32x256xf32>
    %45 = arith.mulf %7, %44 : vector<32x256xf32>
    %c0_20 = arith.constant 0 : index
    %c0_21 = arith.constant 0 : index
    %46 = vector.load %arg3[%c0_20, %c0_21] : memref<256x256xf32, #tpu.memory_space<vmem>>, vector<256x256xf32>
    %cst_22 = arith.constant dense<0.000000e+00> : vector<32x256xf32>
    %47 = tpu.matmul %45, %46, %cst_22 {dimension_numbers = #tpu.dot_dimension_numbers<[1], [0], [0], [1], [0, 0, 1, 1], [], []>} : vector<32x256xf32>, vector<256x256xf32>, vector<32x256xf32> -> vector<32x256xf32>
    %c0_23 = arith.constant 0 : index
    %c0_24 = arith.constant 0 : index
    %48 = vector.load %arg4[%c0_23, %c0_24] : memref<1x256xf32, #tpu.memory_space<vmem>>, vector<1x256xf32>
    %49 = vector.broadcast %48 : vector<1x256xf32> to vector<32x256xf32>
    %50 = arith.addf %47, %49 : vector<32x256xf32>
    %c0_25 = arith.constant 0 : index
    %c0_26 = arith.constant 0 : index
    %51 = vector.load %arg5[%c0_25, %c0_26] : memref<32x256xf32, #tpu.memory_space<vmem>>, vector<32x256xf32>
    tpu.vector_store %arg5[%c0_25, %c0_26], %50 {strides = array<i32>} : memref<32x256xf32, #tpu.memory_space<vmem>>, vector<32x256xf32>,
    return
  }
}

</mosaic_0001>

<bundles_post_ra>
// kernel: gmm_distribution_forward.1
= control target key start
LH: loop header
LB: loop body
LE: loop exit
PB: predicated region body
PF: predicated region fallthrough
CT: control target
= control target key end

     0   :  { %v680_v3 = vmov 0.0   ;;  %vm44_vm0 = vcmask 261120   ;;  %s1113_s1 = inlined_call_operand.vmem [shape: f32[32,256], index: 1, kind: input, shape index: {}]   ;;  %s1114_s3 = inlined_call_operand.vmem [shape: f32[256,256], index: 3, kind: input, shape index: {}]   ;;  %s1115_s0 = inlined_call_operand.vmem [shape: f32[32,32], index: 0, kind: input, shape index: {}]   ;;  %s1116_s2 = inlined_call_operand.vmem [shape: f32[1,256], index: 2, kind: input, shape index: {}]   ;;  %s1117_s4 = inlined_call_operand.vmem [shape: f32[1,256], index: 4, kind: input, shape index: {}]   ;;  %s1118_s5 = inlined_call_operand.vmem [shape: f32[32,256], index: 5, kind: output, shape index: {}]  }
   0x1   :  { %v25_v0 = vld [vmem:[%s1113_s1 + $0x8] sm:$0xff]  ;;  %v27_v1 = vld [vmem:[%s1113_s1 + $0x18] sm:$0xff]  ;;  %v24_v2 = vld [vmem:[%s1113_s1] sm:$0xff]  ;;  %121 = vmatprep.mubr.f32.mxu0 %v680_v3 }
   0x2   :  { %v543_v4 = vpack.c.bf16 %v27_v1, %v25_v0  ;;  %v26_v5 = vld [vmem:[%s1113_s1 + $0x10] sm:$0xff]  ;;  %v29_v6 = vld [vmem:[%s1113_s1 + $0x28] sm:$0xff]  ;;  %v31_v7 = vld [vmem:[%s1113_s1 + $0x38] sm:$0xff] }
   0x3   :  { %v545_v8 = vpack.c.bf16 %v26_v5, %v24_v2  ;;  %v547_v9 = vpack.c.bf16 %v31_v7, %v29_v6  ;;  %v28_v10 = vld [vmem:[%s1113_s1 + $0x20] sm:$0xff]  ;;  %v30_v11 = vld [vmem:[%s1113_s1 + $0x30] sm:$0xff]  ;;  %v363_v13 = vld [vmem:[%s1114_s3 + $0x8] sm:$0xff] }
   0x4   :  { %544 = vmatprep.subr.bf16.mxu0 %v543_v4  ;;  %v549_v12 = vpack.c.bf16 %v30_v11, %v28_v10  ;;  %v365_v14 = vld [vmem:[%s1114_s3 + $0x18] sm:$0xff]  ;;  %v362_v15 = vld [vmem:[%s1114_s3] sm:$0xff]  ;;  %v364_v17 = vld [vmem:[%s1114_s3 + $0x10] sm:$0xff] }
   0x5   :  { %546 = vmatpush1.bf16.msra.mxu0 %v545_v8  ;;  %v551_v16 = vpack.c.bf16 %v365_v14, %v363_v13  ;;  %v367_v18 = vld [vmem:[%s1114_s3 + $0x28] sm:$0xff]  ;;  %v369_v19 = vld [vmem:[%s1114_s3 + $0x38] sm:$0xff]  ;;  %v553_v20 = vpack.c.bf16 %v364_v17, %v362_v15  ;;  %v20_v22 = vld [vmem:[%s1115_s0] sm:$0xff] }
   0x6   :  { %548 = vmatprep.subr.bf16.mxu0 %v547_v9  ;;  %v555_v21 = vpack.c.bf16 %v369_v19, %v367_v18  ;;  %v366_v23 = vld [vmem:[%s1114_s3 + $0x20] sm:$0xff]  ;;  %v368_v24 = vld [vmem:[%s1114_s3 + $0x30] sm:$0xff]  ;;  %v371_v25 = vld [vmem:[%s1114_s3 + $0x48] sm:$0xff] }
   0x7   :  { %615 = vmatprep.subr.bf16.mxu1 %v551_v16  ;;  %v373_v26 = vld [vmem:[%s1114_s3 + $0x58] sm:$0xff]  ;;  %v557_v27 = vpack.c.bf16 %v368_v24, %v366_v23  ;;  %v21_v28 = vld [vmem:[%s1115_s0 + $0x8] sm:$0xff]  ;;  %v370_v30 = vld [vmem:[%s1114_s3 + $0x40] sm:$0xff] }
   0x8   :  { %631 = vmatpush1.bf16.msra.mxu1 %v553_v20  ;;  %v559_v29 = vpack.c.bf16 %v373_v26, %v371_v25  ;;  %v372_v31 = vld [vmem:[%s1114_s3 + $0x50] sm:$0xff]  ;;  %v23_v34 = vld [vmem:[%s1115_s0 + $0x18] sm:$0xff]  ;;  %v375_v35 = vld [vmem:[%s1114_s3 + $0x68] sm:$0xff] }
   0x9   :  { %550 = vmatpush1.bf16.msra.mxu0 %v549_v12  ;;  %616 = vmatprep.subr.bf16.mxu1 %v555_v21  ;;  %v561_v32 = vpack.c.bf16 %v372_v31, %v370_v30  ;;  %v22_v33 = vld [vmem:[%s1115_s0 + $0x10] sm:$0xff]  ;;  %v377_v36 = vld [vmem:[%s1114_s3 + $0x78] sm:$0xff]  ;;  %v374_v38 = vld [vmem:[%s1114_s3 + $0x60] sm:$0xff] }
   0xa   :  { %552 = vmatprep.subr.bf16.mxu0 %v551_v16  ;;  %v563_v37 = vpack.c.bf16 %v377_v36, %v375_v35  ;;  %v376_v39 = vld [vmem:[%s1114_s3 + $0x70] sm:$0xff]  ;;  %v379_v41 = vld [vmem:[%s1114_s3 + $0x88] sm:$0xff]  ;;  %v381_v42 = vld [vmem:[%s1114_s3 + $0x98] sm:$0xff] }
   0xb   :  { %v565_v40 = vpack.c.bf16 %v376_v39, %v374_v38  ;;  %v567_v43 = vpack.c.bf16 %v381_v42, %v379_v41  ;;  %v378_v44 = vld [vmem:[%s1114_s3 + $0x80] sm:$0xff]  ;;  %v380_v45 = vld [vmem:[%s1114_s3 + $0x90] sm:$0xff]  ;;  %v383_v47 = vld [vmem:[%s1114_s3 + $0xa8] sm:$0xff] }
   0xc   :  { %539 = vmatmul.mubr.msk.f32.vlgmr.msra.gmra.mrb[0].mxu0 %vm44_vm0, %v20_v22  ;;  %632 = vmatpush1.bf16.msra.mxu1 %v557_v27  ;;  %v569_v46 = vpack.c.bf16 %v380_v45, %v378_v44  ;;  %v385_v48 = vld [vmem:[%s1114_s3 + $0xb8] sm:$0xff]  ;;  %v382_v50 = vld [vmem:[%s1114_s3 + $0xa0] sm:$0xff]  ;;  %v384_v51 = vld [vmem:[%s1114_s3 + $0xb0] sm:$0xff] }
   0xd   :  { %127 = vmatprep.mubr.f32.mxu0 %v680_v3  ;;  %554 = vmatpush1.bf16.msra.mxu0 %v553_v20  ;;  %v571_v49 = vpack.c.bf16 %v385_v48, %v383_v47  ;;  %v573_v52 = vpack.c.bf16 %v384_v51, %v382_v50  ;;  %v387_v53 = vld [vmem:[%s1114_s3 + $0xc8] sm:$0xff]  ;;  %v389_v54 = vld [vmem:[%s1114_s3 + $0xd8] sm:$0xff]  ;;  %v386_v56 = vld [vmem:[%s1114_s3 + $0xc0] sm:$0xff] }
   0xe   :  { %556 = vmatprep.subr.bf16.mxu0 %v555_v21  ;;  %617 = vmatprep.subr.bf16.mxu1 %v559_v29  ;;  %v575_v55 = vpack.c.bf16 %v389_v54, %v387_v53  ;;  %v388_v57 = vld [vmem:[%s1114_s3 + $0xd0] sm:$0xff]  ;;  %v391_v59 = vld [vmem:[%s1114_s3 + $0xe8] sm:$0xff]  ;;  %v393_v60 = vld [vmem:[%s1114_s3 + $0xf8] sm:$0xff] }
   0xf   :  { %v577_v58 = vpack.c.bf16 %v388_v57, %v386_v56  ;;  %v579_v61 = vpack.c.bf16 %v393_v60, %v391_v59  ;;  %v390_v62 = vld [vmem:[%s1114_s3 + $0xe0] sm:$0xff]  ;;  %v392_v63 = vld [vmem:[%s1114_s3 + $0xf0] sm:$0xff]  ;;  %v395_v1 = vld [vmem:[%s1114_s3 + $0x108] sm:$0xff] }
  0x10   :  { %540 = vmatmul.mubr.msk.f32.gmra.mrb[2].mxu0 %vm44_vm0, %v21_v28  ;;  %633 = vmatpush1.bf16.msra.mxu1 %v561_v32  ;;  %v581_v0 = vpack.c.bf16 %v392_v63, %v390_v62  ;;  %v397_v2 = vld [vmem:[%s1114_s3 + $0x118] sm:$0xff]  ;;  %v394_v4 = vld [vmem:[%s1114_s3 + $0x100] sm:$0xff]  ;;  %v396_v5 = vld [vmem:[%s1114_s3 + $0x110] sm:$0xff] }
  0x11   :  { %133 = vmatprep.mubr.f32.mxu0 %v680_v3  ;;  %558 = vmatpush1.bf16.msra.mxu0 %v557_v27  ;;  %v585_v6 = vpack.c.bf16 %v396_v5, %v394_v4  ;;  %v399_v7 = vld [vmem:[%s1114_s3 + $0x128] sm:$0xff]  ;;  %v401_v8 = vld [vmem:[%s1114_s3 + $0x138] sm:$0xff]  ;;  %v398_v10 = vld [vmem:[%s1114_s3 + $0x120] sm:$0xff] }
  0x12   :  { %560 = vmatprep.subr.bf16.mxu0 %v559_v29  ;;  %618 = vmatprep.subr.bf16.mxu1 %v563_v37  ;;  %v587_v9 = vpack.c.bf16 %v401_v8, %v399_v7  ;;  %v400_v11 = vld [vmem:[%s1114_s3 + $0x130] sm:$0xff]  ;;  %v403_v13 = vld [vmem:[%s1114_s3 + $0x148] sm:$0xff]  ;;  %v405_v14 = vld [vmem:[%s1114_s3 + $0x158] sm:$0xff] }
  0x13   :  { %v589_v12 = vpack.c.bf16 %v400_v11, %v398_v10  ;;  %v591_v15 = vpack.c.bf16 %v405_v14, %v403_v13  ;;  %v402_v16 = vld [vmem:[%s1114_s3 + $0x140] sm:$0xff]  ;;  %v404_v17 = vld [vmem:[%s1114_s3 + $0x150] sm:$0xff]  ;;  %v407_v19 = vld [vmem:[%s1114_s3 + $0x168] sm:$0xff] }
  0x14   :  { %541 = vmatmul.mubr.msk.f32.gmra.mrb[4].mxu0 %vm44_vm0, %v22_v33  ;;  %634 = vmatpush1.bf16.msra.mxu1 %v565_v40  ;;  %v593_v18 = vpack.c.bf16 %v404_v17, %v402_v16  ;;  %v409_v20 = vld [vmem:[%s1114_s3 + $0x178] sm:$0xff]  ;;  %v406_v22 = vld [vmem:[%s1114_s3 + $0x160] sm:$0xff]  ;;  %v408_v23 = vld [vmem:[%s1114_s3 + $0x170] sm:$0xff] }
  0x15   :  { %139 = vmatprep.mubr.f32.mxu0 %v680_v3  ;;  %562 = vmatpush1.bf16.msra.mxu0 %v561_v32  ;;  %v583_v3 = vpack.c.bf16 %v397_v2, %v395_v1  ;;  %v595_v21 = vpack.c.bf16 %v409_v20, %v407_v19  ;;  %v597_v24 = vpack.c.bf16 %v408_v23, %v406_v22  ;;  %v411_v25 = vld [vmem:[%s1114_s3 + $0x188] sm:$0xff]  ;;  %v413_v26 = vld [vmem:[%s1114_s3 + $0x198] sm:$0xff]  ;;  %v410_v28 = vld [vmem:[%s1114_s3 + $0x180] sm:$0xff] }
  0x16   :  { %564 = vmatprep.subr.bf16.mxu0 %v563_v37  ;;  %619 = vmatprep.subr.bf16.mxu1 %v567_v43  ;;  %v599_v27 = vpack.c.bf16 %v413_v26, %v411_v25  ;;  %v412_v29 = vld [vmem:[%s1114_s3 + $0x190] sm:$0xff]  ;;  %v415_v31 = vld [vmem:[%s1114_s3 + $0x1a8] sm:$0xff]  ;;  %v417_v32 = vld [vmem:[%s1114_s3 + $0x1b8] sm:$0xff] }
  0x17   :  { %v601_v30 = vpack.c.bf16 %v412_v29, %v410_v28  ;;  %v603_v33 = vpack.c.bf16 %v417_v32, %v415_v31  ;;  %v416_v35 = vld [vmem:[%s1114_s3 + $0x1b0] sm:$0xff]  ;;  %v419_v37 = vld [vmem:[%s1114_s3 + $0x1c8] sm:$0xff]  ;;  %v421_v38 = vld [vmem:[%s1114_s3 + $0x1d8] sm:$0xff] }
  0x18   :  { %542 = vmatmul.mubr.msk.f32.gmra.mrb[6].mxu0 %vm44_vm0, %v23_v34  ;;  %635 = vmatpush1.bf16.msra.mxu1 %v569_v46  ;;  %v414_v34 = vld [vmem:[%s1114_s3 + $0x1a0] sm:$0xff]  ;;  %v607_v39 = vpack.c.bf16 %v421_v38, %v419_v37  ;;  %v420_v41 = vld [vmem:[%s1114_s3 + $0x1d0] sm:$0xff]  ;;  %v423_v42 = vld [vmem:[%s1114_s3 + $0x1e8] sm:$0xff] }
  0x19   :  { %566 = vmatpush1.bf16.msra.mxu0 %v565_v40  ;;  %620 = vmatprep.subr.bf16.mxu1 %v571_v49  ;;  %v605_v36 = vpack.c.bf16 %v416_v35, %v414_v34  ;;  %v418_v40 = vld [vmem:[%s1114_s3 + $0x1c0] sm:$0xff]  ;;  %v425_v44 = vld [vmem:[%s1114_s3 + $0x1f8] sm:$0xff] }
  0x1a   :  { %568 = vmatprep.subr.bf16.mxu0 %v567_v43  ;;  %v609_v43 = vpack.c.bf16 %v420_v41, %v418_v40  ;;  %v422_v45 = vld [vmem:[%s1114_s3 + $0x1e0] sm:$0xff]  ;;  %v611_v47 = vpack.c.bf16 %v425_v44, %v423_v42 }
  0x1c   :  { %636 = vmatpush1.bf16.msra.mxu1 %v573_v52 }
  0x1d   :  { %570 = vmatpush1.bf16.msra.mxu0 %v569_v46  ;;  %621 = vmatprep.subr.bf16.mxu1 %v575_v55  ;;  %v424_v46 = vld [vmem:[%s1114_s3 + $0x1f0] sm:$0xff] }
  0x1e   :  { %572 = vmatprep.subr.bf16.mxu0 %v571_v49  ;;  %v613_v48 = vpack.c.bf16 %v424_v46, %v422_v45  ;;  %v34_v49 = vlaneseq }
  0x20   :  { %637 = vmatpush1.bf16.msra.mxu1 %v577_v58  ;;  %v943_v50 = vshrl.u32 %v34_v49, 7 }
  0x21   :  { %574 = vmatpush1.bf16.msra.mxu0 %v573_v52  ;;  %622 = vmatprep.subr.bf16.mxu1 %v579_v61  ;;  %v32_v52 = vld [vmem:[%s1116_s2] sm:$0x3] }
  0x22   :  { %576 = vmatprep.subr.bf16.mxu0 %v575_v55  ;;  %v36_v51 = vsub.s32 0, %v943_v50  ;;  %v40_v53 = vsub.s32 1, %v943_v50 }
  0x24   :  { %638 = vmatpush1.bf16.msra.mxu1 %v581_v0  ;;  %v37_v54 = vrot.slane %v32_v52, %v36_v51  ;;  %v41_v55 = vrot.slane %v32_v52, %v40_v53 }
  0x25   :  { %578 = vmatpush1.bf16.msra.mxu0 %v577_v58  ;;  %623 = vmatprep.subr.bf16.mxu1 %v583_v3 }
  0x26   :  { %580 = vmatprep.subr.bf16.mxu0 %v579_v61 }
  0x28   :  { %639 = vmatpush1.bf16.msra.mxu1 %v585_v6 }
  0x29   :  { %582 = vmatpush1.bf16.msra.mxu0 %v581_v0  ;;  %624 = vmatprep.subr.bf16.mxu1 %v587_v9 }
  0x2a   :  { %584 = vmatprep.subr.bf16.mxu0 %v583_v3 }
  0x2c   :  { %640 = vmatpush1.bf16.msra.mxu1 %v589_v12 }
  0x2d   :  { %586 = vmatpush1.bf16.msra.mxu0 %v585_v6  ;;  %625 = vmatprep.subr.bf16.mxu1 %v591_v15 }
  0x2e   :  { %588 = vmatprep.subr.bf16.mxu0 %v587_v9 }
  0x30   :  { %641 = vmatpush1.bf16.msra.mxu1 %v593_v18 }
  0x31   :  { %590 = vmatpush1.bf16.msra.mxu0 %v589_v12  ;;  %626 = vmatprep.subr.bf16.mxu1 %v595_v21 }
  0x32   :  { %592 = vmatprep.subr.bf16.mxu0 %v591_v15 }
  0x34   :  { %642 = vmatpush1.bf16.msra.mxu1 %v597_v24 }
  0x35   :  { %594 = vmatpush1.bf16.msra.mxu0 %v593_v18  ;;  %627 = vmatprep.subr.bf16.mxu1 %v599_v27 }
  0x36   :  { %596 = vmatprep.subr.bf16.mxu0 %v595_v21 }
  0x38   :  { %643 = vmatpush1.bf16.msra.mxu1 %v601_v30 }
  0x39   :  { %598 = vmatpush1.bf16.msra.mxu0 %v597_v24  ;;  %628 = vmatprep.subr.bf16.mxu1 %v603_v33 }
  0x3a   :  { %600 = vmatprep.subr.bf16.mxu0 %v599_v27 }
  0x3c   :  { %644 = vmatpush1.bf16.msra.mxu1 %v605_v36 }
  0x3d   :  { %602 = vmatpush1.bf16.msra.mxu0 %v601_v30  ;;  %629 = vmatprep.subr.bf16.mxu1 %v607_v39 }
  0x3e   :  { %604 = vmatprep.subr.bf16.mxu0 %v603_v33 }
  0x40   :  { %645 = vmatpush1.bf16.msra.mxu1 %v609_v43 }
  0x41   :  { %606 = vmatpush1.bf16.msra.mxu0 %v605_v36  ;;  %630 = vmatprep.subr.bf16.mxu1 %v611_v47 }
  0x42   :  { %608 = vmatprep.subr.bf16.mxu0 %v607_v39 }
  0x44   :  { %646 = vmatpush1.bf16.msra.mxu1 %v613_v48 }
  0x45   :  { %610 = vmatpush1.bf16.msra.mxu0 %v609_v43 }
  0x46   :  { %612 = vmatprep.subr.bf16.mxu0 %v611_v47 }
  0x49   :  { %614 = vmatpush1.bf16.msra.mxu0 %v613_v48 }
  0xdf   :  { %v123_v56 = vpop.f32.mrb[0].mxu0 }
  0xe0   :  { %v124_v57 = vadd.f32 %v123_v56, %v37_v54  ;;  %v125_v58 = vpop.f32.mrb[1].mxu0 }
  0xe1   :  { %v126_v59 = vadd.f32 %v125_v58, %v41_v55 }
  0xe2   :  { %v954_v60 = vmul.f32 0.70710677, %v124_v57  ;;  %v982_v28 = vmul.f32 0.5, %v124_v57 }
  0xe3   :  { %v956_v61 = vmul.f32 0.70710677, %v126_v59  ;;  %v129_v62 = vpop.f32.mrb[2].mxu0  ;;  %v987_v31 = vmul.f32 0.5, %v126_v59 }
  0xe4   :  { %v162_v63 = vand.u32 2147483647, %v954_v60  ;;  %v130_v0 = vadd.f32 %v129_v62, %v37_v54  ;;  %v131_v1 = vpop.f32.mrb[3].mxu0  ;;  %vm322_vm1 = vcmp.ge.f32.partialorder %v954_v60, 0.0 }
  0xe5   :  { %v163_v2 = vand.u32 2147483647, %v956_v61  ;;  %v960_v3 = vadd.f32 %v131_v1, %v41_v55  ;;  %vm323_vm2 = vcmp.ge.f32.partialorder %v956_v61, 0.0 }
  0xe6   :  { %v170_v4 = vmul.f32 0.3275911, %v162_v63  ;;  %v962_v5 = vmul.f32 0.70710677, %v130_v0  ;;  %v274_v24 = vsub.f32 0.0, %v162_v63  ;;  %v999_v45 = vmul.f32 0.5, %v130_v0 }
  0xe7   :  { %v171_v6 = vmul.f32 0.3275911, %v163_v2  ;;  %v965_v7 = vmul.f32 0.70710677, %v960_v3  ;;  %v135_v8 = vpop.f32.mrb[4].mxu0  ;;  %v275_v26 = vsub.f32 0.0, %v163_v2 }
  0xe8   :  { %v178_v9 = vadd.f32 1.0, %v170_v4  ;;  %v164_v10 = vand.u32 2147483647, %v962_v5  ;;  %v137_v11 = vpop.f32.mrb[5].mxu0  ;;  %v969_v14 = vadd.f32 %v135_v8, %v37_v54  ;;  %v282_v35 = vmul.f32 %v274_v24, %v162_v63 }
  0xe9   :  { %v179_v12 = vadd.f32 1.0, %v171_v6  ;;  %v165_v13 = vand.u32 2147483647, %v965_v7  ;;  %v974_v22 = vadd.f32 %v137_v11, %v41_v55  ;;  %v283_v40 = vmul.f32 %v275_v26, %v163_v2 }
  0xea   :  { %648 = vrcp.f32 %v178_v9  ;;  %v172_v15 = vmul.f32 0.3275911, %v164_v10  ;;  %v972_v21 = vmul.f32 0.70710677, %v969_v14  ;;  %v276_v32 = vsub.f32 0.0, %v164_v10 }
  0xeb   :  { %v173_v16 = vmul.f32 0.3275911, %v165_v13  ;;  %v141_v17 = vpop.f32.mrb[6].mxu0  ;;  %650 = vrcp.f32 %v179_v12  ;;  %v980_v27 = vmul.f32 0.70710677, %v974_v22  ;;  %v277_v36 = vsub.f32 0.0, %v165_v13 }
  0xec   :  { %v180_v18 = vadd.f32 1.0, %v172_v15  ;;  %v143_v19 = vpop.f32.mrb[7].mxu0  ;;  %v976_v23 = vadd.f32 %v141_v17, %v37_v54  ;;  %v166_v25 = vand.u32 2147483647, %v972_v21  ;;  %v284_v48 = vmul.f32 %v276_v32, %v164_v10 }
  0xed   :  { %v181_v20 = vadd.f32 1.0, %v173_v16  ;;  %v167_v33 = vand.u32 2147483647, %v980_v27  ;;  %v990_v34 = vadd.f32 %v143_v19, %v41_v55  ;;  %v290_v56 = vmul.f32 1.442695, %v282_v35 }
  0xee   :  { %652 = vrcp.f32 %v180_v18  ;;  %v174_v29 = vmul.f32 0.3275911, %v166_v25  ;;  %v985_v30 = vmul.f32 0.70710677, %v976_v23  ;;  %v278_v41 = vsub.f32 0.0, %v166_v25 }
  0xef   :  { %654 = vrcp.f32 %v181_v20  ;;  %v175_v42 = vmul.f32 0.3275911, %v167_v33  ;;  %v996_v43 = vmul.f32 0.70710677, %v990_v34  ;;  %v279_v52 = vsub.f32 0.0, %v167_v33 }
  0xf0   :  { %v182_v37 = vadd.f32 1.0, %v174_v29  ;;  %v168_v38 = vand.u32 2147483647, %v985_v30  ;;  %v285_v57 = vmul.f32 %v277_v36, %v165_v13  ;;  %v292_v62 = vmul.f32 1.442695, %v283_v40 }
  0xf1   :  { %v183_v49 = vadd.f32 1.0, %v175_v42  ;;  %v169_v54 = vand.u32 2147483647, %v996_v43  ;;  %v286_v63 = vmul.f32 %v278_v41, %v166_v25  ;;  %v294_v8 = vmul.f32 1.442695, %v284_v48 }
  0xf2   :  { %656 = vrcp.f32 %v182_v37  ;;  %v176_v46 = vmul.f32 0.3275911, %v168_v38  ;;  %v280_v4 = vsub.f32 0.0, %v168_v38  ;;  %v287_v9 = vmul.f32 %v279_v52, %v167_v33 }
  0xf3   :  { %658 = vrcp.f32 %v183_v49  ;;  %v177_v0 = vmul.f32 0.3275911, %v169_v54  ;;  %v296_v13 = vmul.f32 1.442695, %v285_v57  ;;  %v298_v16 = vmul.f32 1.442695, %v286_v63 }
  0xf4   :  { %v993_v39 = vpop.eup %648  ;;  %v184_v58 = vadd.f32 1.0, %v176_v46  ;;  %v288_v20 = vmul.f32 %v280_v4, %v168_v38  ;;  %v300_v25 = vmul.f32 1.442695, %v287_v9  ;;  %v281_v35 = vsub.f32 0.0, %v169_v54 }
  0xf5   :  { %v202_v44 = vmul.f32 1.0614054, %v993_v39  ;;  %v1001_v47 = vpop.eup %650  ;;  %v185_v10 = vadd.f32 1.0, %v177_v0  ;;  %v1018_v37 = vmul.f32 0.5, %v960_v3  ;;  %vm325_vm3 = vcmp.ge.f32.partialorder %v965_v7, 0.0 }
  0xf6   :  { %660 = vrcp.f32 %v184_v58  ;;  %v203_v6 = vmul.f32 1.0614054, %v1001_v47  ;;  %v289_v57 = vmul.f32 %v281_v35, %v169_v54  ;;  %vm324_vm4 = vcmp.ge.f32.partialorder %v962_v5, 0.0 }
  0xf7   :  { %v210_v55 = vadd.f32 -1.4531521, %v202_v44  ;;  %662 = vpow2.f32 %v290_v56  ;;  %v302_v44 = vmul.f32 1.442695, %v288_v20  ;;  %vm326_vm5 = vcmp.ge.f32.partialorder %v972_v21, 0.0 }
  0xf8   :  { %v1004_v59 = vpop.eup %652  ;;  %v211_v15 = vadd.f32 -1.4531521, %v203_v6  ;;  %664 = vpow2.f32 %v292_v62  ;;  %vm327_vm6 = vcmp.ge.f32.partialorder %v980_v27, 0.0  ;;  %v151_v21 = vmul.f32 0.5, %v974_v22 }
  0xf9   :  { %v1006_v1 = vpop.eup %654  ;;  %v218_v2 = vmul.f32 %v993_v39, %v210_v55  ;;  %v204_v18 = vmul.f32 1.0614054, %v1004_v59  ;;  %666 = vrcp.f32 %v185_v10  ;;  %vm328_vm7 = vcmp.ge.f32.partialorder %v985_v30, 0.0  ;;  %v426_v30 = vld [vmem:[%s1117_s4] sm:$0x3] }
  0xfa   :  { %v205_v11 = vmul.f32 1.0614054, %v1006_v1  ;;  %v219_v24 = vmul.f32 %v1001_v47, %v211_v15  ;;  %668 = vpow2.f32 %v294_v8  ;;  %vm329_vm8 = vcmp.ge.f32.partialorder %v996_v43, 0.0 }
  0xfb   :  { %v226_v12 = vadd.f32 1.4214138, %v218_v2  ;;  %v212_v29 = vadd.f32 -1.4531521, %v204_v18  ;;  %670 = vpow2.f32 %v296_v13  ;;  %v304_v18 = vmul.f32 1.442695, %v289_v57 }
  0xfc   :  { %v213_v17 = vadd.f32 -1.4531521, %v205_v11  ;;  %v1015_v32 = vpop.eup %656  ;;  %v227_v36 = vadd.f32 1.4214138, %v219_v24  ;;  %672 = vpow2.f32 %v298_v16  ;;  %v431_v43 = vrot.slane %v426_v30, %v36_v51 }
  0xfd   :  { %v234_v19 = vmul.f32 %v993_v39, %v226_v12  ;;  %v220_v38 = vmul.f32 %v1004_v59, %v212_v29  ;;  %v206_v41 = vmul.f32 1.0614054, %v1015_v32  ;;  %v1024_v48 = vpop.eup %658  ;;  %674 = vpow2.f32 %v300_v25 }
  0xfe   :  { %v221_v26 = vmul.f32 %v1006_v1, %v213_v17  ;;  %v235_v46 = vmul.f32 %v1001_v47, %v227_v36  ;;  %v207_v62 = vmul.f32 1.0614054, %v1024_v48  ;;  %676 = vpow2.f32 %v302_v44 }
  0xff   :  { %v242_v33 = vadd.f32 -0.28449672, %v234_v19  ;;  %v228_v52 = vadd.f32 1.4214138, %v220_v38  ;;  %v214_v55 = vadd.f32 -1.4531521, %v206_v41  ;;  %678 = vpow2.f32 %v304_v18 }
 0x100   :  { %v229_v40 = vadd.f32 1.4214138, %v221_v26  ;;  %v1027_v3 = vpop.eup %660  ;;  %v243_v58 = vadd.f32 -0.28449672, %v235_v46  ;;  %v215_v10 = vadd.f32 -1.4531521, %v207_v62 }
 0x101   :  { %v250_v42 = vmul.f32 %v993_v39, %v242_v33  ;;  %v236_v0 = vmul.f32 %v1004_v59, %v228_v52  ;;  %v222_v2 = vmul.f32 %v1015_v32, %v214_v55  ;;  %v208_v4 = vmul.f32 1.0614054, %v1027_v3  ;;  %v663_v6 = vpop.eup %662 }
 0x102   :  { %v237_v49 = vmul.f32 %v1006_v1, %v229_v40  ;;  %v251_v9 = vmul.f32 %v1001_v47, %v243_v58  ;;  %v665_v54 = vpop.eup %664  ;;  %v223_v20 = vmul.f32 %v1024_v48, %v215_v10 }
 0x103   :  { %v258_v56 = vadd.f32 0.2548296, %v250_v42  ;;  %v244_v12 = vadd.f32 -0.28449672, %v236_v0  ;;  %v230_v13 = vadd.f32 1.4214138, %v222_v2  ;;  %v1037_v16 = vpop.eup %666 }
 0x104   :  { %v245_v63 = vadd.f32 -0.28449672, %v237_v49  ;;  %v216_v15 = vadd.f32 -1.4531521, %v208_v4  ;;  %v259_v19 = vadd.f32 0.2548296, %v251_v9  ;;  %v669_v24 = vpop.eup %668 }
 0x105   :  { %v266_v8 = vmul.f32 %v993_v39, %v258_v56  ;;  %v252_v25 = vmul.f32 %v1004_v59, %v244_v12  ;;  %v238_v26 = vmul.f32 %v1015_v32, %v230_v13  ;;  %v209_v29 = vmul.f32 1.0614054, %v1037_v16  ;;  %v671_v33 = vpop.eup %670 }
 0x106   :  { %v253_v11 = vmul.f32 %v1006_v1, %v245_v63  ;;  %v267_v36 = vmul.f32 %v1001_v47, %v259_v19  ;;  %v231_v40 = vadd.f32 1.4214138, %v223_v20  ;;  %v224_v38 = vmul.f32 %v1027_v3, %v216_v15  ;;  %v673_v49 = vpop.eup %672 }
 0x107   :  { %v306_v17 = vmul.f32 %v663_v6, %v266_v8  ;;  %v260_v42 = vadd.f32 0.2548296, %v252_v25  ;;  %v246_v44 = vadd.f32 -0.28449672, %v238_v26  ;;  %v217_v46 = vadd.f32 -1.4531521, %v209_v29  ;;  %v675_v58 = vpop.eup %674 }
 0x108   :  { %v261_v39 = vadd.f32 0.2548296, %v253_v11  ;;  %v307_v55 = vmul.f32 %v665_v54, %v267_v36  ;;  %v239_v56 = vmul.f32 %v1024_v48, %v231_v40  ;;  %v232_v57 = vadd.f32 1.4214138, %v224_v38  ;;  %v677_v54 = vpop.eup %676 }
 0x109   :  { %v314_v35 = vsub.f32 1.0, %v306_v17  ;;  %v268_v62 = vmul.f32 %v1004_v59, %v260_v42  ;;  %v254_v63 = vmul.f32 %v1015_v32, %v246_v44  ;;  %v225_v0 = vmul.f32 %v1037_v16, %v217_v46 }
 0x10a   :  { %v269_v41 = vmul.f32 %v1006_v1, %v261_v39  ;;  %v315_v2 = vsub.f32 1.0, %v307_v55  ;;  %v247_v4 = vadd.f32 -0.28449672, %v239_v56  ;;  %v240_v6 = vmul.f32 %v1027_v3, %v232_v57  ;;  %v679_v55 = vpop.eup %678 }
 0x10b   :  { %v330_v52 = vsub.f32 0.0, %v314_v35  ;;  %v308_v9 = vmul.f32 %v669_v24, %v268_v62  ;;  %v262_v10 = vadd.f32 0.2548296, %v254_v63  ;;  %v233_v59 = vadd.f32 1.4214138, %v225_v0 }
 0x10c   :  { %v309_v47 = vmul.f32 %v671_v33, %v269_v41  ;;  %v331_v11 = vsub.f32 0.0, %v315_v2  ;;  %v255_v12 = vmul.f32 %v1024_v48, %v247_v4  ;;  %v248_v13 = vadd.f32 -0.28449672, %v240_v6 }
 0x10d   :  { %v338_v1 = vsel %vm322_vm1, %v314_v35, %v330_v52  ;;  %v316_v19 = vsub.f32 1.0, %v308_v9  ;;  %v270_v60 = vmul.f32 %v1015_v32, %v262_v10  ;;  %v241_v18 = vmul.f32 %v1037_v16, %v233_v59 }
 0x10e   :  { %v317_v8 = vsub.f32 1.0, %v309_v47  ;;  %v346_v15 = vadd.f32 1.0, %v338_v1  ;;  %v339_v20 = vsel %vm323_vm2, %v315_v2, %v331_v11  ;;  %v263_v39 = vadd.f32 0.2548296, %v255_v12 }
 0x10f   :  { %v256_v24 = vmul.f32 %v1027_v3, %v248_v13  ;;  %v347_v25 = vadd.f32 1.0, %v339_v20  ;;  %v332_v29 = vsub.f32 0.0, %v316_v19  ;;  %v310_v33 = vmul.f32 %v673_v49, %v270_v60 }
 0x110   :  { %v333_v17 = vsub.f32 0.0, %v317_v8  ;;  %v271_v36 = vmul.f32 %v1024_v48, %v263_v39  ;;  %v249_v40 = vadd.f32 -0.28449672, %v241_v18  ;;  %v354_v32 = vmul.f32 %v346_v15, %v982_v28 }
 0x111   :  { %v264_v38 = vadd.f32 0.2548296, %v256_v24  ;;  %v355_v61 = vmul.f32 %v347_v25, %v987_v31  ;;  %v340_v41 = vsel %vm324_vm4, %v316_v19, %v332_v29  ;;  %v318_v42 = vsub.f32 1.0, %v310_v33 }
 0x112   :  { %v341_v26 = vsel %vm325_vm3, %v317_v8, %v333_v17  ;;  %v348_v46 = vadd.f32 1.0, %v340_v41  ;;  %v311_v7 = vmul.f32 %v675_v58, %v271_v36  ;;  %v257_v52 = vmul.f32 %v1037_v16, %v249_v40 }
 0x113   :  { %v349_v35 = vadd.f32 1.0, %v341_v26  ;;  %502 = vmatprep.mubr.f32.mxu0 %v355_v61  ;;  %v334_v49 = vsub.f32 0.0, %v318_v42  ;;  %v272_v48 = vmul.f32 %v1027_v3, %v264_v38  ;;  %v153_v10 = vmul.f32 0.5, %v990_v34 }
 0x114   :  { %503 = vmatmul.mubr.f32.vlgmr.msra.gmra.mrb[8].mxu0 %v354_v32  ;;  %v356_v28 = vmul.f32 %v348_v46, %v999_v45  ;;  %v319_v31 = vsub.f32 1.0, %v311_v7  ;;  %v265_v5 = vadd.f32 0.2548296, %v257_v52  ;;  %v150_v45 = vmul.f32 0.5, %v969_v14 }
 0x115   :  { %v357_v44 = vmul.f32 %v349_v35, %v1018_v37  ;;  %v342_v56 = vsel %vm326_vm5, %v318_v42, %v334_v49  ;;  %v312_v57 = vmul.f32 %v677_v54, %v272_v48  ;;  %v152_v54 = vmul.f32 0.5, %v976_v23 }
 0x116   :  { %v335_v37 = vsub.f32 0.0, %v319_v31  ;;  %v273_v58 = vmul.f32 %v1037_v16, %v265_v5  ;;  %v350_v3 = vadd.f32 1.0, %v342_v56  ;;  %v435_v12 = vrot.slane %v426_v30, %v40_v53 }
 0x117   :  { %508 = vmatprep.mubr.f32.mxu1 %v357_v44  ;;  %v320_v47 = vsub.f32 1.0, %v312_v57 }
 0x118   :  { %509 = vmatmul.mubr.f32.vlgmr.msra.gmra.mrb[0].mxu1 %v356_v28  ;;  %v343_v62 = vsel %vm327_vm6, %v319_v31, %v335_v37  ;;  %v313_v63 = vmul.f32 %v679_v55, %v273_v58  ;;  %v358_v8 = vmul.f32 %v350_v3, %v150_v45 }
 0x119   :  { %v351_v0 = vadd.f32 1.0, %v343_v62  ;;  %v336_v1 = vsub.f32 0.0, %v320_v47 }
 0x11a   :  { %v321_v2 = vsub.f32 1.0, %v313_v63 }
 0x11b   :  { %v359_v4 = vmul.f32 %v351_v0, %v151_v21  ;;  %v344_v6 = vsel %vm328_vm7, %v320_v47, %v336_v1 }
 0x11c   :  { %v337_v9 = vsub.f32 0.0, %v321_v2  ;;  %v352_v16 = vadd.f32 1.0, %v344_v6 }
 0x11d   :  { %514 = vmatprep.mubr.f32.mxu1 %v359_v4 }
 0x11e   :  { %515 = vmatmul.mubr.f32.gmra.mrb[2].mxu1 %v358_v8  ;;  %v345_v27 = vsel %vm329_vm8, %v321_v2, %v337_v9  ;;  %v360_v14 = vmul.f32 %v352_v16, %v152_v54 }
 0x11f   :  { %v353_v22 = vadd.f32 1.0, %v345_v27 }
 0x121   :  { %v361_v11 = vmul.f32 %v353_v22, %v153_v10 }
 0x123   :  { %520 = vmatprep.mubr.f32.mxu1 %v361_v11 }
 0x124   :  { %521 = vmatmul.mubr.f32.gmra.mrb[4].mxu1 %v360_v14 }
 0x1e7   :  { %v504_v59 = vpop.f32.mrb[8].mxu0 }
 0x1e8   :  { %v505_v13 = vadd.f32 %v504_v59, %v431_v43  ;;  %v506_v34 = vpop.f32.mrb[9].mxu0 }
 0x1e9   :  { %v507_v15 = vadd.f32 %v506_v34, %v435_v12 }
 0x1ea   :  { %527 = vst [vmem:[%s1118_s5] sm:$0xff] %v505_v13 }
 0x1eb   :  { %v510_v17 = vpop.f32.mrb[0].mxu1  ;;  %528 = vst [vmem:[%s1118_s5 + $0x8] sm:$0xff] %v507_v15 }
 0x1ec   :  { %v511_v23 = vadd.f32 %v510_v17, %v431_v43  ;;  %v512_v19 = vpop.f32.mrb[1].mxu1 }
 0x1ed   :  { %v513_v60 = vadd.f32 %v512_v19, %v435_v12 }
 0x1ee   :  { %529 = vst [vmem:[%s1118_s5 + $0x10] sm:$0xff] %v511_v23 }
 0x1ef   :  { %530 = vst [vmem:[%s1118_s5 + $0x18] sm:$0xff] %v513_v60 }
 0x1f1   :  { %v516_v50 = vpop.f32.mrb[2].mxu1 }
 0x1f2   :  { %v517_v51 = vadd.f32 %v516_v50, %v431_v43  ;;  %v518_v53 = vpop.f32.mrb[3].mxu1 }
 0x1f3   :  { %v519_v20 = vadd.f32 %v518_v53, %v435_v12 }
 0x1f4   :  { %531 = vst [vmem:[%s1118_s5 + $0x20] sm:$0xff] %v517_v51 }
 0x1f5   :  { %532 = vst [vmem:[%s1118_s5 + $0x28] sm:$0xff] %v519_v20 }
 0x1f7   :  { %v522_v39 = vpop.f32.mrb[4].mxu1 }
 0x1f8   :  { %v523_v18 = vadd.f32 %v522_v39, %v431_v43  ;;  %v524_v24 = vpop.f32.mrb[5].mxu1 }
 0x1f9   :  { %v525_v25 = vadd.f32 %v524_v24, %v435_v12 }
 0x1fa   :  { %533 = vst [vmem:[%s1118_s5 + $0x30] sm:$0xff] %v523_v18 }
 0x1fb   :  { %534 = vst [vmem:[%s1118_s5 + $0x38] sm:$0xff] %v525_v25 }

</bundles_post_ra>
